<compile_context>
chip_gen: v6e
topology: v6e:2x2x1
jax: 0.10.0
libtpu: 0.0.40
codegen_flags: <defaults>
</compile_context>

<pallas_src>
import functools

import jax
import jax.numpy as jnp
from jax import lax
from jax.experimental import pallas as pl
from jax.experimental.pallas import tpu as pltpu


def _joints_mse_kernel(pred_ref, gt_ref, w_ref, out_ref, *, rows, bk, need_mask):
    i = pl.program_id(0)
    row_start = pl.multiple_of(i * rows, 8)

    # (rows, HW) input block, upcast in-kernel (inputs may be bf16).
    p = pred_ref[...].astype(jnp.float32)
    g = gt_ref[...].astype(jnp.float32)
    # Per-row weights sliced from the fully-resident (bk_pad, 1) array.
    w = w_ref[pl.ds(row_start, rows), :]                       # (rows, 1) f32

    d = p - g
    sq = (d * d) * (w * w)        # w^2 * (p - g)^2  ==  (p*w - g*w)^2

    if need_mask:
        # Mask rows of the last (possibly partial) block that fall past B*K.
        row_ids = row_start + lax.broadcasted_iota(jnp.int32, (rows, 1), 0)
        sq = jnp.where(row_ids < bk, sq, 0.0)

    hw = sq.shape[-1]
    # Reduce only over the leading (non-(8,128)) axis: pure vreg adds on the
    # VPU, no cross-lane/sublane XLU work inside the steady-state loop.
    out_ref[...] = jnp.sum(sq.reshape(rows // 8, 8, hw), axis=0)


def joints_mse_loss(output, target, target_weight=None):
    """output/target: (B, K, H, W); target_weight: (B, K, 1) or None."""
    B, K, H, W = output.shape
    HW = H * W
    BK = B * K

    # Free, contiguous reshapes -- no transpose, no extra HBM round-trip.
    pred = output.reshape(BK, HW)
    gt = target.reshape(BK, HW)
    if target_weight is None:
        w = jnp.ones((BK, 1), dtype=jnp.float32)
    else:
        w = target_weight.reshape(BK, 1).astype(jnp.float32)

    # Tile sizing: fat blocks to amortize per-grid-step overhead, capped at
    # ~4 MiB per input block so 2 inputs x 2 double-buffers <= ~16 MiB
    # (safe on v7x's 64 MiB physical / 32 MiB scoped VMEM; v5e/v6e have more).
    itemsize = jnp.dtype(output.dtype).itemsize
    block_budget = 4 * 1024 * 1024                         # bytes / input block
    rows = max(8, (block_budget // (HW * itemsize)) // 8 * 8)
    rows = min(rows, pl.cdiv(BK, 8) * 8)                   # no bigger than data
    num_blocks = pl.cdiv(BK, rows)
    bk_pad = num_blocks * rows

    if bk_pad != BK:
        # Pad the (tiny) weight array so the in-kernel slice is always in-bounds.
        w = jnp.pad(w, ((0, bk_pad - BK), (0, 0)))

    kernel = functools.partial(
        _joints_mse_kernel, rows=rows, bk=BK, need_mask=(bk_pad != BK))

    partials = pl.pallas_call(
        kernel,
        out_shape=jax.ShapeDtypeStruct((num_blocks * 8, HW), jnp.float32),
        grid_spec=pltpu.PrefetchScalarGridSpec(
            num_scalar_prefetch=0,
            grid=(num_blocks,),
            in_specs=[
                pl.BlockSpec((rows, HW), lambda i: (i, 0)),
                pl.BlockSpec((rows, HW), lambda i: (i, 0)),
                # Entire weight array resident (constant block index): no
                # per-step sliver DMAs.
                pl.BlockSpec((bk_pad, 1), lambda i: (0, 0)),
            ],
            out_specs=pl.BlockSpec((8, HW), lambda i: (i, 0)),
        ),
        compiler_params=pltpu.CompilerParams(
            # Per-block partial sums -> no cross-step state -> the grid axis
            # is truly parallel (shards across both TCs on v7x).
            dimension_semantics=("parallel",),
            vmem_limit_bytes=32 * 1024 * 1024,
        ),
        cost_estimate=pl.CostEstimate(
            flops=4 * BK * HW,
            transcendentals=0,
            bytes_accessed=(2 * BK * HW * itemsize
                            + bk_pad * 4
                            + num_blocks * 8 * HW * 4),
        ),
    )(pred, gt, w)

    # Tiny final reduce + scale in the wrapper (negligible next to HBM reads).
    scale = 0.5 / (K * B * HW)
    return (jnp.sum(partials) * scale).astype(jnp.float32)


def _reference(output, target, target_weight):
    B, K, H, W = output.shape
    pred = output.reshape(B, K, H * W)
    gt = target.reshape(B, K, H * W)
    loss = 0.0
    for idx in range(K):
        hp = pred[:, idx, :]
        hg = gt[:, idx, :]
        w = target_weight[:, idx]  # (B, 1)
        loss += 0.5 * jnp.mean((hp * w - hg * w) ** 2)
    return loss / K


if __name__ == "__main__":
    key = jax.random.PRNGKey(0)
    k1, k2, k3 = jax.random.split(key, 3)

    B, K, H, W = 2, 4, 16, 16
    output = jax.random.normal(k1, (B, K, H, W), dtype=jnp.float32)
    target = jax.random.normal(k2, (B, K, H, W), dtype=jnp.float32)
    target_weight = jax.random.uniform(k3, (B, K, 1), dtype=jnp.float32)

    loss = joints_mse_loss(output, target, target_weight)
    loss = jax.block_until_ready(loss)

    ref = _reference(output, target, target_weight)
    assert jnp.allclose(loss, ref, rtol=1e-5, atol=1e-6), (loss, ref)

    # Also check the unweighted path.
    loss_nw = jax.block_until_ready(joints_mse_loss(output, target, None))
    ref_nw = _reference(output, target, jnp.ones((B, K, 1), jnp.float32))
    assert jnp.allclose(loss_nw, ref_nw, rtol=1e-5, atol=1e-6), (loss_nw, ref_nw)

    print("KERNEL_OK")
</pallas_src>

<mosaic_0001>
module attributes {stable_mosaic.version = 11 : i64} {
  func.func @_joints_mse_kernel(%arg0: i32, %arg1: memref<8x256xf32, #tpu.memory_space<vmem>>, %arg2: memref<8x256xf32, #tpu.memory_space<vmem>>, %arg3: memref<8x1xf32, #tpu.memory_space<vmem>>, %arg4: memref<8x256xf32, #tpu.memory_space<vmem>>) attributes {dimension_semantics = [#tpu.dimension_semantics<parallel>], iteration_bounds = array<i64: 1>, scalar_prefetch = 0 : i64, scratch_operands = 0 : i64, tpu.core_type = #tpu.core_type<tc>, window_params = [{transform_indices = @transform_0, window_bounds = array<i64: 8, 256>}, {transform_indices = @transform_1, window_bounds = array<i64: 8, 256>}, {pipeline_mode = #tpu.pipeline_mode<synchronous>, transform_indices = @transform_2, window_bounds = array<i64: 8, 1>}, {transform_indices = @transform_3, window_bounds = array<i64: 8, 256>}]} {
    %c8_i32 = arith.constant 8 : i32
    %0 = arith.muli %arg0, %c8_i32 : i32
    %1 = tpu.assume_multiple %0, 8 : i32
    %c0 = arith.constant 0 : index
    %c0_0 = arith.constant 0 : index
    %2 = vector.load %arg1[%c0, %c0_0] : memref<8x256xf32, #tpu.memory_space<vmem>>, vector<8x256xf32>
    %c0_1 = arith.constant 0 : index
    %c0_2 = arith.constant 0 : index
    %3 = vector.load %arg2[%c0_1, %c0_2] : memref<8x256xf32, #tpu.memory_space<vmem>>, vector<8x256xf32>
    %4 = arith.index_cast %1 : i32 to index
    %c0_3 = arith.constant 0 : index
    %5 = vector.load %arg3[%4, %c0_3] : memref<8x1xf32, #tpu.memory_space<vmem>>, vector<8x1xf32>
    %6 = arith.subf %2, %3 : vector<8x256xf32>
    %7 = arith.mulf %6, %6 : vector<8x256xf32>
    %8 = arith.mulf %5, %5 : vector<8x1xf32>
    %9 = vector.broadcast %8 : vector<8x1xf32> to vector<8x256xf32>
    %10 = arith.mulf %7, %9 : vector<8x256xf32>
    %11 = vector.shape_cast %10 : vector<8x256xf32> to vector<1x8x256xf32>
    %cst = arith.constant dense<0.000000e+00> : vector<8x256xf32>
    %12 = vector.multi_reduction <add>, %11, %cst [0] : vector<1x8x256xf32> to vector<8x256xf32>
    %c0_4 = arith.constant 0 : index
    %c0_5 = arith.constant 0 : index
    %13 = vector.load %arg4[%c0_4, %c0_5] : memref<8x256xf32, #tpu.memory_space<vmem>>, vector<8x256xf32>
    tpu.vector_store %arg4[%c0_4, %c0_5], %12 {strides = array<i32>} : memref<8x256xf32, #tpu.memory_space<vmem>>, vector<8x256xf32>,
    return
  }
  func.func @transform_0(%arg0: i32) -> (i32, i32) {
    %c0_i32 = arith.constant 0 : i32
    %c0_i32_0 = arith.constant 0 : i32
    return %arg0, %c0_i32 : i32, i32
  }
  func.func @transform_1(%arg0: i32) -> (i32, i32) {
    %c0_i32 = arith.constant 0 : i32
    %c0_i32_0 = arith.constant 0 : i32
    return %arg0, %c0_i32 : i32, i32
  }
  func.func @transform_2(%arg0: i32) -> (i32, i32) {
    %c0_i32 = arith.constant 0 : i32
    %c0_i32_0 = arith.constant 0 : i32
    %c0_i32_1 = arith.constant 0 : i32
    return %c0_i32, %c0_i32_0 : i32, i32
  }
  func.func @transform_3(%arg0: i32) -> (i32, i32) {
    %c0_i32 = arith.constant 0 : i32
    %c0_i32_0 = arith.constant 0 : i32
    return %arg0, %c0_i32 : i32, i32
  }
}

</mosaic_0001>

<bundles_post_ra>
// kernel: tpu_custom_call.1
= control target key start
LH: loop header
LB: loop body
LE: loop exit
PB: predicated region body
PF: predicated region fallthrough
CT: control target
= control target key end

     0   :  { %8 = vsyncpa [#allocation3], 0  ;;  %s185_s0 = inlined_call_operand.hbm [shape: f32[8,256], index: 0, kind: input, shape index: {}]   ;;  %s186_s1 = inlined_call_operand.hbm [shape: f32[8,256], index: 1, kind: input, shape index: {}]   ;;  %s187_s2 = inlined_call_operand.vmem [shape: f32[8,1], index: 2, kind: input, shape index: {}]   ;;  %s188_s3 = inlined_call_operand.hbm [shape: f32[8,256], index: 3, kind: output, shape index: {}]  }
   0x1   :  { %9 = vsyncpa [#allocation6], 0 }
   0x2   :  { %10 = vsyncpa [#allocation4], 0  ;;  %s149_s12 = smov [#allocation2]   ;;  %s150_s14 = smov [#allocation5]  }
   0x3   :  { %s17_s13 = sshll.u32 %s149_s12, 4  ;;  %s27_s15 = sshll.u32 %s150_s14, 4  ;;  %s18_s13 = int_to_ptr.vmem [resolvable:$true] %s17_s13  ;;  %s28_s15 = int_to_ptr.vmem [resolvable:$true] %s27_s15 }
   0x4   :  { %s91_s16 = scalar_lea.vmem %s18_s13, 256  ;;  %p96_p1 = scmp.lt.s32.totalorder %s18_s13, %s18_s13 }
   0x5   :  { %p92_p0 = scmp.ne.s32.totalorder %s18_s13, %s91_s16  ;;  %p97_p2 = scmp.lt.s32.totalorder %s91_s16, %s91_s16 }
   0x7   :  { %p98_p3 = por %p97_p2, %p96_p1 }
   0x9   :  { %p99_p4 = pnand %p98_p3, %p92_p0 }
   0xb   :  { %102 = shalt.err (!%p99_p4)
}
   0xc   :  { %20 = dma.hbm_to_vmem [thread:$0]  %s185_s0, 256, %s18_s13, [#allocation3]  }
   0xd   :  { %s111_s19 = scalar_lea.vmem %s28_s15, 256  ;;  %p116_p6 = scmp.lt.s32.totalorder %s28_s15, %s28_s15 }
   0xe   :  { %p112_p5 = scmp.ne.s32.totalorder %s28_s15, %s111_s19  ;;  %p117_p7 = scmp.lt.s32.totalorder %s111_s19, %s111_s19 }
  0x10   :  { %p118_p8 = por %p117_p7, %p116_p6 }
  0x12   :  { %p119_p9 = pnand %p118_p8, %p112_p5 }
  0x14   :  { %122 = shalt.err (!%p119_p9)
}
  0x15   :  { %30 = dma.hbm_to_vmem [thread:$0]  %s186_s1, 256, %s28_s15, [#allocation6]  }
  0x16   :  { %143 = dma.done.wait [#allocation3], 256  }
  0x17   :  { %144 = vsyncadd [#allocation3], 4294967040 }
  0x18   :  { %145 = dma.done.wait [#allocation6], 256  }
  0x19   :  { %146 = vsyncadd [#allocation6], 4294967040  ;;  %v151_v0 = vmov 0   ;;  %v45_v1 = vld [vmem:[%s187_s2] sm:$0xff]  ;;  %v41_v4 = vld [vmem:[#allocation2 + $0x8] sm:$0xff]  ;;  %s152_s0 = smov [#allocation7]  }
  0x1a   :  { %82 = vset.pattern.permute.xlu0 %v151_v0  ;;  %v50_v2 = vmul.f32 %v45_v1, %v45_v1  ;;  %v40_v3 = vld [vmem:[#allocation2] sm:$0xff]  ;;  %v42_v5 = vld [vmem:[#allocation5] sm:$0xff]  ;;  %v43_v6 = vld [vmem:[#allocation5 + $0x8] sm:$0xff]  ;;  %s68_s1 = sshll.u32 %s152_s0, 4  ;;  %s69_s1 = int_to_ptr.vmem [resolvable:$true] %s68_s1 }
  0x1b   :  { %v46_v7 = vsub.f32 %v40_v3, %v42_v5  ;;  %v47_v8 = vsub.f32 %v41_v4, %v43_v6  ;;  %s123_s24 = scalar_lea.vmem %s69_s1, 256  ;;  %p128_p11 = scmp.lt.s32.totalorder %s69_s1, %s69_s1 }
  0x1c   :  { %53 = vperm.xlu0 %82, %v50_v2   ;;  %p124_p10 = scmp.ne.s32.totalorder %s69_s1, %s123_s24  ;;  %p129_p12 = scmp.lt.s32.totalorder %s123_s24, %s123_s24 }
  0x1d   :  { %v48_v9 = vmul.f32 %v46_v7, %v46_v7  ;;  %v49_v10 = vmul.f32 %v47_v8, %v47_v8 }
  0x1e   :  { %p130_p13 = por %p129_p12, %p128_p11 }
  0x20   :  { %p131_p0 = pnand %p130_p13, %p124_p10 }
  0x97   :  { %v54_v11 = vpop.permute.xlu0 %53 }
  0x98   :  { %v56_v12 = vmul.f32 %v54_v11, %v48_v9  ;;  %v57_v13 = vmul.f32 %v54_v11, %v49_v10 }
  0x9a   :  { %60 = vst [vmem:[#allocation7] sm:$0xff] %v56_v12  ;;  %61 = vst [vmem:[#allocation7 + $0x8] sm:$0xff] %v57_v13 }
  0x9b   :  { %134 = shalt.err (!%p131_p0)
}
  0x9c   :  { %71 = dma.vmem_to_hbm [thread:$0]  %s69_s1, 256, %s188_s3, [#allocation4]  }
  0x9d   :  { %147 = dma.done.wait [#allocation4], 256  }
  0x9e   :  { %148 = vsyncadd [#allocation4], 4294967040 }
  0x9f   :  { %75 = vsyncpa [#allocation3], 1 }
  0xa0   :  { %76 = vsyncpa [#allocation6], 1 }
  0xa1   :  { %77 = vsyncpa [#allocation4], 1 }

</bundles_post_ra>
